<compile_context>
chip_gen: v7x
topology: tpu7x:2x2x1
jax: 0.10.0
libtpu: 0.0.40
codegen_flags: <defaults>
</compile_context>

<pallas_src>
import jax
import jax.numpy as jnp
from jax.experimental import pallas as pl
from jax.experimental.pallas import tpu as pltpu


def _round_up(x, m):
    return ((x + m - 1) // m) * m


def _stats_kernel(feat_ref, mask_row_ref, sums_ref):
    """Accumulate [sum(mask*x); sum((mask*x)^2); sum(mask)] into sums_ref."""

    @pl.when(pl.program_id(0) == 0)
    def _init():
        sums_ref[...] = jnp.zeros_like(sums_ref)

    x = feat_ref[...]                              # (tile_n, Fp)
    m = mask_row_ref[...].astype(x.dtype)          # (1, tile_n)

    # Per-feature reductions on the MXU (instead of a VPU/XLU sum over axis 0).
    s1 = jnp.dot(m, x, preferred_element_type=jnp.float32)          # sum m*x
    s2 = jnp.dot(m * m, x * x, preferred_element_type=jnp.float32)  # sum (m*x)^2

    n = jnp.sum(m.astype(jnp.float32))             # scalar sum(mask) for tile
    n_row = jnp.full((1, s1.shape[1]), n, dtype=jnp.float32)

    sums_ref[...] += jnp.concatenate([s1, s2, n_row], axis=0)


def _apply_kernel(feat_ref, mask_col_ref, scale_ref, shift_ref, out_ref):
    """out = (x * mask) * scale + shift, with scale/shift hoisted per feature."""
    x = feat_ref[...].astype(jnp.float32)          # (tile_n, Fp)
    m = mask_col_ref[...].astype(jnp.float32)      # (tile_n, 1)
    out = (x * m) * scale_ref[...] + shift_ref[...]
    out_ref[...] = out.astype(out_ref.dtype)


def masked_batch_norm_1d(features, mask, weight, bias, eps=1e-5):
    """features: (B, T, F); mask: (B, T) or None; weight/bias: (1, 1, F)."""
    B, T, F = features.shape
    N = B * T

    # Lane-dense feature padding (F -> multiple of 128); padded lanes stay 0.
    Fp = _round_up(F, 128)

    # Tile sizing: ~<=4 MiB per feature-tile buffer, cap 1024 sublanes.
    tile_n = min(1024, (1 << 20) // Fp)
    tile_n = max(128, (tile_n // 128) * 128)       # lane constraint for mask row
    if tile_n >= N:
        tile_n = _round_up(N, 8)                   # single-tile case
    Np = _round_up(N, tile_n)
    grid_n = Np // tile_n

    feats2d = features.reshape(N, F)
    if (Np, Fp) != (N, F):
        feats2d = jnp.pad(feats2d, ((0, Np - N), (0, Fp - F)))

    if mask is None:
        mask_flat = jnp.ones((N,), dtype=jnp.float32)
    else:
        mask_flat = mask.reshape(N).astype(jnp.float32)
    if Np != N:
        # Padded rows must carry mask = 0 so they do not contaminate the stats.
        mask_flat = jnp.pad(mask_flat, (0, Np - N))
    mask_row = mask_flat.reshape(1, Np)            # lane-dense lhs for MXU dots
    mask_col = mask_flat.reshape(Np, 1)            # per-row broadcast in phase 2

    w_row = jnp.pad(weight.reshape(1, F).astype(jnp.float32), ((0, 0), (0, Fp - F)))
    b_row = jnp.pad(bias.reshape(1, F).astype(jnp.float32), ((0, 0), (0, Fp - F)))

    vmem_limit = 48 * 1024 * 1024

    # ---- phase 1: masked sum / sum-of-squares / count ----------------------
    sums = pl.pallas_call(
        _stats_kernel,
        out_shape=jax.ShapeDtypeStruct((3, Fp), jnp.float32),
        grid_spec=pltpu.PrefetchScalarGridSpec(
            num_scalar_prefetch=0,
            grid=(grid_n,),
            in_specs=[
                pl.BlockSpec((tile_n, Fp), lambda i: (i, 0)),
                pl.BlockSpec((1, tile_n), lambda i: (0, i)),
            ],
            out_specs=pl.BlockSpec((3, Fp), lambda i: (0, 0)),
        ),
        compiler_params=pltpu.CompilerParams(
            dimension_semantics=("arbitrary",),
            vmem_limit_bytes=vmem_limit,
        ),
    )(feats2d, mask_row)

    # ---- finalize: per-feature constants (tiny (1, Fp) math) ---------------
    n = sums[2, 0]                                             # sum(mask)
    mean = sums[0:1, :] / n
    var = (sums[1:2, :] + (jnp.float32(N) - 2.0 * n) * mean * mean) / n
    inv_std = jax.lax.rsqrt(var + jnp.float32(eps))
    scale = w_row * inv_std                                    # (1, Fp)
    shift = b_row - mean * scale                               # (1, Fp)

    # ---- phase 2: apply normalization tile-by-tile --------------------------
    out2d = pl.pallas_call(
        _apply_kernel,
        out_shape=jax.ShapeDtypeStruct((Np, Fp), features.dtype),
        grid_spec=pltpu.PrefetchScalarGridSpec(
            num_scalar_prefetch=0,
            grid=(grid_n,),
            in_specs=[
                pl.BlockSpec((tile_n, Fp), lambda i: (i, 0)),
                pl.BlockSpec((tile_n, 1), lambda i: (i, 0)),
                pl.BlockSpec((1, Fp), lambda i: (0, 0)),
                pl.BlockSpec((1, Fp), lambda i: (0, 0)),
            ],
            out_specs=pl.BlockSpec((tile_n, Fp), lambda i: (i, 0)),
        ),
        compiler_params=pltpu.CompilerParams(
            dimension_semantics=("parallel",),
            vmem_limit_bytes=vmem_limit,
        ),
    )(feats2d, mask_col, scale, shift)

    return out2d[:N, :F].reshape(B, T, F)


def _reference(features, mask, weight, bias, eps=1e-5):
    B, T, F = features.shape
    if mask is not None:
        masked = features * mask.reshape(B, T, 1).astype(features.dtype)
        n = jnp.sum(mask.astype(jnp.float32))
    else:
        masked = features
        n = jnp.float32(B * T)
    mean = jnp.sum(masked, axis=(0, 1), keepdims=True) / n
    var = jnp.sum((masked - mean) ** 2, axis=(0, 1), keepdims=True) / n
    normed = (masked - mean) / jnp.sqrt(var + eps)
    return normed * weight + bias


if __name__ == "__main__":
    key = jax.random.PRNGKey(0)
    B, T, F = 2, 8, 32  # (batch, timesteps, num_features)

    k1, k2 = jax.random.split(key)
    features = jax.random.normal(k1, (B, T, F), dtype=jnp.float32)
    mask = (jax.random.uniform(k2, (B, T)) > 0.3).astype(jnp.float32)

    # Deterministic params per reset_parameters(): weight = 1, bias = 0.
    weight = jnp.ones((1, 1, F), dtype=jnp.float32)
    bias = jnp.zeros((1, 1, F), dtype=jnp.float32)

    out = masked_batch_norm_1d(features, mask, weight, bias, eps=1e-5)
    out = jax.block_until_ready(out)

    ref = _reference(features, mask, weight, bias, eps=1e-5)
    assert out.shape == (B, T, F)
    assert jnp.allclose(out, ref, atol=1e-4, rtol=1e-4)

    print("KERNEL_OK")
</pallas_src>

<mosaic_0001>
module attributes {stable_mosaic.version = 11 : i64} {
  func.func @_stats_kernel(%arg0: i32, %arg1: memref<16x128xf32, #tpu.memory_space<vmem>>, %arg2: memref<1x16xf32, #tpu.memory_space<vmem>>, %arg3: memref<3x128xf32, #tpu.memory_space<vmem>>) attributes {dimension_semantics = [#tpu.dimension_semantics<arbitrary>], iteration_bounds = array<i64: 1>, scalar_prefetch = 0 : i64, scratch_operands = 0 : i64, tpu.core_type = #tpu.core_type<tc>, window_params = [{transform_indices = @transform_0, window_bounds = array<i64: 16, 128>}, {transform_indices = @transform_1, window_bounds = array<i64: 1, 16>}, {pipeline_mode = #tpu.pipeline_mode<synchronous>, transform_indices = @transform_2, window_bounds = array<i64: 3, 128>}]} {
    %c0_i32 = arith.constant 0 : i32
    %0 = arith.cmpi eq, %arg0, %c0_i32 : i32
    %1 = arith.extui %0 : i1 to i32
    %c0_i32_0 = arith.constant 0 : i32
    %2 = arith.cmpi ne, %1, %c0_i32_0 : i32
    scf.if %2 {
      %cst_10 = arith.constant 0.000000e+00 : f32
      %18 = vector.broadcast %cst_10 : f32 to vector<3x128xf32>
      %c0_11 = arith.constant 0 : index
      %c0_12 = arith.constant 0 : index
      %19 = vector.load %arg3[%c0_11, %c0_12] : memref<3x128xf32, #tpu.memory_space<vmem>>, vector<3x128xf32>
      tpu.vector_store %arg3[%c0_11, %c0_12], %18 {strides = array<i32>} : memref<3x128xf32, #tpu.memory_space<vmem>>, vector<3x128xf32>,
    } else {
    }
    %c0 = arith.constant 0 : index
    %c0_1 = arith.constant 0 : index
    %3 = vector.load %arg1[%c0, %c0_1] : memref<16x128xf32, #tpu.memory_space<vmem>>, vector<16x128xf32>
    %c0_2 = arith.constant 0 : index
    %c0_3 = arith.constant 0 : index
    %4 = vector.load %arg2[%c0_2, %c0_3] : memref<1x16xf32, #tpu.memory_space<vmem>>, vector<1x16xf32>
    %cst = arith.constant dense<0.000000e+00> : vector<1x128xf32>
    %5 = tpu.matmul %4, %3, %cst {dimension_numbers = #tpu.dot_dimension_numbers<[1], [0], [0], [1], [0, 0, 1, 1], [], []>} : vector<1x16xf32>, vector<16x128xf32>, vector<1x128xf32> -> vector<1x128xf32>
    %6 = arith.mulf %4, %4 : vector<1x16xf32>
    %7 = arith.mulf %3, %3 : vector<16x128xf32>
    %cst_4 = arith.constant dense<0.000000e+00> : vector<1x128xf32>
    %8 = tpu.matmul %6, %7, %cst_4 {dimension_numbers = #tpu.dot_dimension_numbers<[1], [0], [0], [1], [0, 0, 1, 1], [], []>} : vector<1x16xf32>, vector<16x128xf32>, vector<1x128xf32> -> vector<1x128xf32>
    %9 = vector.shape_cast %4 : vector<1x16xf32> to vector<1x1x16xf32>
    %cst_5 = arith.constant dense<0.000000e+00> : vector<1xf32>
    %10 = vector.multi_reduction <add>, %9, %cst_5 [1, 2] : vector<1x1x16xf32> to vector<1xf32>
    %11 = vector.shape_cast %10 : vector<1xf32> to vector<1x1x1xf32>
    %12 = vector.extract %11[0, 0, 0] : f32 from vector<1x1x1xf32>
    %13 = vector.broadcast %12 : f32 to vector<1x128xf32>
    %c0_6 = arith.constant 0 : index
    %c0_7 = arith.constant 0 : index
    %14 = vector.load %arg3[%c0_6, %c0_7] : memref<3x128xf32, #tpu.memory_space<vmem>>, vector<3x128xf32>
    %15 = tpu.concatenate %5, %8, %13 in 0 : vector<1x128xf32>, vector<1x128xf32>, vector<1x128xf32> -> vector<3x128xf32>
    %16 = arith.addf %14, %15 : vector<3x128xf32>
    %c0_8 = arith.constant 0 : index
    %c0_9 = arith.constant 0 : index
    %17 = vector.load %arg3[%c0_8, %c0_9] : memref<3x128xf32, #tpu.memory_space<vmem>>, vector<3x128xf32>
    tpu.vector_store %arg3[%c0_8, %c0_9], %16 {strides = array<i32>} : memref<3x128xf32, #tpu.memory_space<vmem>>, vector<3x128xf32>,
    return
  }
  func.func @transform_0(%arg0: i32) -> (i32, i32) {
    %c0_i32 = arith.constant 0 : i32
    %c0_i32_0 = arith.constant 0 : i32
    return %arg0, %c0_i32 : i32, i32
  }
  func.func @transform_1(%arg0: i32) -> (i32, i32) {
    %c0_i32 = arith.constant 0 : i32
    %c0_i32_0 = arith.constant 0 : i32
    return %c0_i32, %arg0 : i32, i32
  }
  func.func @transform_2(%arg0: i32) -> (i32, i32) {
    %c0_i32 = arith.constant 0 : i32
    %c0_i32_0 = arith.constant 0 : i32
    %c0_i32_1 = arith.constant 0 : i32
    return %c0_i32, %c0_i32_0 : i32, i32
  }
}

</mosaic_0001>

<bundles_post_ra>
// kernel: tpu_custom_call.1
= control target key start
LH: loop header
LB: loop body
LE: loop exit
PB: predicated region body
PF: predicated region fallthrough
CT: control target
= control target key end

     0   :  { %7 = vsyncpa [#allocation3], 0  ;;  %s355_s0 = inlined_call_operand.hbm [shape: f32[16,128], index: 0, kind: input, shape index: {}]   ;;  %s356_s1 = inlined_call_operand.vmem [shape: f32[1,16], index: 1, kind: input, shape index: {}]   ;;  %s357_s2 = inlined_call_operand.hbm [shape: f32[3,128], index: 2, kind: output, shape index: {}]  }
   0x1   :  { %8 = vsyncpa [#allocation4], 0  ;;  %s306_s9 = smov [#allocation2]   ;;  %s258_s13 = scalar_lea.hbm %s355_s0, 256 }
   0x2   :  { %s14_s10 = sshll.u32 %s306_s9, 4  ;;  %p259_p0 = scmp.ne.s32.totalorder %s355_s0, %s258_s13  ;;  %s15_s10 = int_to_ptr.vmem [resolvable:$true] %s14_s10 }
   0x3   :  { %p262_p1 = scmp.lt.u32.totalorder %s258_s13, %s355_s0 }
   0x5   :  { %p264_p2 = pnand %p262_p1, %p259_p0 }
   0x7   :  { %267 = shalt.err (!%p264_p2)
}
   0x8   :  { %s268_s18 = scalar_lea.vmem %s15_s10, 256  ;;  %p273_p4 = scmp.lt.s32.totalorder %s15_s10, %s15_s10 }
   0x9   :  { %p269_p3 = scmp.ne.s32.totalorder %s15_s10, %s268_s18  ;;  %p274_p5 = scmp.lt.s32.totalorder %s268_s18, %s268_s18 }
   0xb   :  { %p275_p6 = por %p274_p5, %p273_p4 }
   0xd   :  { %p276_p7 = pnand %p275_p6, %p269_p3 }
   0xf   :  { %279 = shalt.err (!%p276_p7)
}
  0x10   :  { %s307_s19 = smov 128   ;;  %s308_s20 = smov 8  }
  0x11   :  { %20 = dma.hbm_to_vmem [thread:$0]  %s355_s0, 256, %s15_s10, [#allocation3], %s307_s19, %s307_s19, %s308_s20  }
  0x12   :  { %302 = dma.done.wait [#allocation3], 256  }
  0x13   :  { %303 = vsyncadd [#allocation3], 4294967040  ;;  %v309_v0 = vmov 0.0|0.0   ;;  %v310_v1 = vmov 0.0   ;;  %vm311_vm0 = vmmov 0   ;;  %vm184_vm1 = vcmask 122880  }
  0x14   :  { %246 = vmatprep.subr.bf16.mxu1 %v309_v0  ;;  %243 = vmatprep.subr.bf16.mxu0 %v309_v0  ;;  %30 = vst [vmem:[#allocation5] sm:$0x7] %v310_v1  ;;  %v31_v2 = vld [vmem:[#allocation2] sm:$0xff]  ;;  %v32_v3 = vld [vmem:[#allocation2 + $0x8] sm:$0xff]  ;;  %vm34_vm2 = vcmask 130048   ;;  %vm200_vm3 = vcmask 1040384  }
  0x15   :  { %240 = vmatprep.mubr.msk.f32.mxu1 %vm311_vm0, %v310_v1  ;;  %233 = vmatprep.mubr.msk.f32.mxu0 %vm311_vm0, %v310_v1  ;;  %v109_v4 = vmul.f32 %v31_v2, %v31_v2  ;;  %v110_v5 = vmul.f32 %v32_v3, %v32_v3  ;;  %v244_v6 = vpack.c.bf16 %v32_v3, %v31_v2  ;;  %v33_v7 = vld [vmem:[%s356_s1] sm:$0x1]  ;;  %vm202_vm4 = vcmask 1041408   ;;  %s312_s1 = smov [#allocation5]  }
  0x16   :  { %v185_v8 = vsel %vm184_vm1, %v33_v7, 0.0  ;;  %v108_v10 = vmul.f32 %v33_v7, %v33_v7  ;;  %s212_s25 = sshll.u32 %s312_s1, 4  ;;  %s213_s25 = int_to_ptr.vmem [resolvable:$true] %s212_s25 }
  0x17   :  { %v247_v9 = vpack.c.bf16 %v110_v5, %v109_v4  ;;  %245 = vmatpush3.bf16.msra.mxu0 %v244_v6  ;;  %186 = vadd.xlane.f32.xlu0 %v185_v8  ;;  %s280_s26 = scalar_lea.vmem %s213_s25, 64  ;;  %p285_p9 = scmp.lt.s32.totalorder %s213_s25, %s213_s25 }
  0x18   :  { %p281_p8 = scmp.ne.s32.totalorder %s213_s25, %s280_s26  ;;  %p286_p10 = scmp.lt.s32.totalorder %s280_s26, %s280_s26 }
  0x19   :  { %248 = vmatpush3.bf16.msra.mxu1 %v247_v9 }
  0x1a   :  { %234 = vmatmul.mubr.msk.f32.vlgmr.msra.gmra.mrb[0].mxu0 %vm34_vm2, %v33_v7  ;;  %p287_p11 = por %p286_p10, %p285_p9 }
  0x1b   :  { %v196_v23 = vld [vmem:[#allocation5] sm:$0x7] }
  0x1c   :  { %241 = vmatmul.mubr.msk.f32.vlgmr.msra.gmra.mrb[0].mxu1 %vm34_vm2, %v108_v10  ;;  %p288_p12 = pnand %p287_p11, %p281_p8 }
  0xa4   :  { %v187_v11 = vpop.xlane.xlu0 %186 }
  0xa5   :  { %v188_v12 = vrot.slane %v187_v11, 4 }
  0xa7   :  { %v189_v13 = vadd.f32 %v188_v12, %v187_v11 }
  0xa9   :  { %v190_v14 = vrot.slane %v189_v13, 2 }
  0xab   :  { %v191_v15 = vadd.f32 %v190_v14, %v189_v13 }
  0xad   :  { %v192_v16 = vrot.slane %v191_v15, 1 }
  0xaf   :  { %v193_v17 = vadd.f32 %v192_v16, %v191_v15 }
  0xb1   :  { %249 = vpush %v193_v17 }
  0xe2   :  { %s250_s0 = spop %249 }
  0xe3   :  { %v195_v24 = vstv %s250_s0 }
  0xed   :  { %v104_v18 = vpop.f32.mrb[0].mxu0 }
  0xee   :  { %v235_v19 = vpop.f32.mrb[1].mxu0 }
  0xef   :  { %v180_v20 = vpop.f32.mrb[0].mxu1 }
  0xf0   :  { %v198_v21 = vrot.slane %v180_v20, 7  ;;  %v242_v22 = vpop.f32.mrb[1].mxu1 }
  0xf2   :  { %v201_v25 = vsel %vm200_vm3, %v104_v18, %v198_v21 }
  0xf3   :  { %v203_v26 = vsel %vm202_vm4, %v201_v25, %v195_v24 }
  0xf4   :  { %v204_v27 = vadd.f32 %v203_v26, %v196_v23 }
  0xf6   :  { %205 = vst [vmem:[#allocation5] sm:$0x7] %v204_v27 }
  0xf7   :  { %291 = shalt.err (!%p288_p12)
}
  0xf8   :  { %s292_s29 = scalar_lea.hbm %s357_s2, 64 }
  0xf9   :  { %p293_p13 = scmp.ne.s32.totalorder %s357_s2, %s292_s29  ;;  %p296_p0 = scmp.lt.u32.totalorder %s292_s29, %s357_s2 }
  0xfb   :  { %p298_p1 = pnand %p296_p0, %p293_p13 }
  0xfd   :  { %301 = shalt.err (!%p298_p1)
}
  0xfe   :  { %215 = dma.vmem_to_hbm [thread:$0]  %s213_s25, 64, %s357_s2, [#allocation4]  }
  0xff   :  { %304 = dma.done.wait [#allocation4], 64  }
 0x100   :  { %305 = vsyncadd [#allocation4], 4294967232 }
 0x101   :  { %219 = vsyncpa [#allocation3], 1 }
 0x102   :  { %220 = vsyncpa [#allocation4], 1 }

</bundles_post_ra>
